<compile_context>
chip_gen: v7x
topology: tpu7x:2x2x1
jax: 0.10.0
libtpu: 0.0.40
codegen_flags: <defaults>
</compile_context>

<pallas_src>
import functools
from typing import NamedTuple, Tuple

import jax
import jax.numpy as jnp
from jax.experimental import pallas as pl
from jax.experimental.pallas import tpu as pltpu

_LANE = 128                        # vreg lane width (last-dim quantum)
_SUBLANE = 8                       # f32 sublane quantum (second-to-last dim)
_DEFAULT_BATCH_TILE = 512          # rows/grid-step for large batches
_SINGLE_TILE_MAX_ROWS = 1024       # up to this many rows -> grid = 1
_DEFAULT_VMEM_LIMIT = 32 * 1024 * 1024  # Mosaic default scoped VMEM limit


def _round_up(n, m):
    return ((n + m - 1) // m) * m


class PaddedGeneratorParams(NamedTuple):
    # layers[i] = (W_pad (din_p, dout_p) in operand dtype, b_pad (1, dout_p) f32)
    layers: Tuple[Tuple[jax.Array, jax.Array], ...]
    embedding_dim: int
    data_dim: int


def pad_generator_params(params, operand_dtype=jnp.float32):
    """Pad every feature dim to a multiple of 128 ONCE (hoisted out of forward).

    W is cast to `operand_dtype` (e.g. bfloat16 for v6e/v7x byte savings); the
    bias stays f32 since it only feeds the f32 elementwise tail.  Zero padding
    is exact: zero weight rows/cols + zero bias + ReLU(0)=0 keep padded columns
    at exactly zero through every layer.
    """
    layers = []
    for (w, b) in params:
        di, do = w.shape
        di_p, do_p = _round_up(di, _LANE), _round_up(do, _LANE)
        wp = jnp.zeros((di_p, do_p), operand_dtype).at[:di, :do].set(
            w.astype(operand_dtype))
        bp = jnp.zeros((1, do_p), jnp.float32).at[0, :do].set(
            b.astype(jnp.float32))
        layers.append((wp, bp))
    return PaddedGeneratorParams(
        tuple(layers), params[0][0].shape[0], params[-1][0].shape[1])


def _fused_mlp_kernel(x_ref, *refs, n_layers):
    """refs = (w0, b0, w1, b1, ..., w_{L-1}, b_{L-1}, o_ref).

    Full MLP for one batch tile, entirely in VMEM/vregs.  Matmuls accumulate
    in f32 (preferred_element_type); bias add and ReLU stay in f32 even when
    the matmul operands are bf16 (v5e VPU has no bf16 datapath anyway).
    """
    o_ref = refs[-1]
    h = x_ref[...]
    for li in range(n_layers):
        w = refs[2 * li][...]
        b = refs[2 * li + 1][...]             # (1, Dout_pad) f32, broadcasts
        lhs = h if h.dtype == w.dtype else h.astype(w.dtype)
        acc = jnp.dot(lhs, w, preferred_element_type=jnp.float32) + b
        if li < n_layers - 1:
            acc = jnp.maximum(acc, 0.0)       # ReLU on hidden layers only
        h = acc
    o_ref[...] = h.astype(o_ref.dtype)


def generator_forward(x, padded: PaddedGeneratorParams, *,
                      batch_tile=_DEFAULT_BATCH_TILE,
                      single_tile_max_rows=_SINGLE_TILE_MAX_ROWS):
    """Forward pass of Generator as a single fused Pallas TPU kernel.

    x:      (B, embedding_dim) activations.
    padded: output of pad_generator_params (padded once at init).
    """
    B, Din = x.shape
    assert Din == padded.embedding_dim
    layers = padded.layers
    n_layers = len(layers)
    assert n_layers >= 1
    operand_dtype = layers[0][0].dtype
    out_dtype = x.dtype
    din_p = layers[0][0].shape[0]
    dout_p = layers[-1][0].shape[1]
    dout = padded.data_dim

    # --- batch tiling: one tile for small batches (grid=1, no per-step
    # pipeline overhead on single-TC v5e/v6e), 512-row tiles for big ones. ----
    rows = _round_up(max(B, _SUBLANE), _SUBLANE)
    if rows <= max(single_tile_max_rows, batch_tile):
        bt = rows
    else:
        bt = _round_up(batch_tile, _SUBLANE)
    Bp = _round_up(B, bt)
    n_tiles = Bp // bt

    xp = jnp.zeros((Bp, din_p), operand_dtype).at[:B, :Din].set(
        x.astype(operand_dtype))

    # Constant block index -> weights/biases fetched into VMEM once and kept
    # resident.  With a real multi-step batch grid, request a single buffer
    # (no point double-buffering data that never changes between steps).
    if n_tiles > 1:
        def const_spec(shape):
            return pl.BlockSpec(shape, lambda i: (0, 0),
                                pipeline_mode=pl.Buffered(1))
    else:
        def const_spec(shape):
            return pl.BlockSpec(shape, lambda i: (0, 0))

    in_specs = [pl.BlockSpec((bt, din_p), lambda i: (i, 0))]
    flat_inputs = [xp]
    for (wp, bp) in layers:
        in_specs.append(const_spec(wp.shape))
        in_specs.append(const_spec(bp.shape))
        flat_inputs.extend([wp, bp])

    # Only raise the scoped VMEM limit when the resident footprint needs it
    # (matters for CTGAN-scale hidden/one-hot output dims, esp. v7x's 64 MiB).
    weight_bytes = sum(w.size * w.dtype.itemsize + b.size * b.dtype.itemsize
                       for (w, b) in layers)
    io_bytes = bt * din_p * xp.dtype.itemsize + bt * dout_p * x.dtype.itemsize
    est_bytes = weight_bytes + (2 * io_bytes if n_tiles > 1 else io_bytes)
    cp_kwargs = dict(dimension_semantics=("parallel",))
    # TODO(synk): on v7x with large batches, pltpu.CORE_PARALLEL on this axis
    # would engage the second TensorCore; kept "parallel" for portability.
    if est_bytes > _DEFAULT_VMEM_LIMIT:
        cp_kwargs["vmem_limit_bytes"] = min(2 * est_bytes, 100 * 1024 * 1024)

    out_padded = pl.pallas_call(
        functools.partial(_fused_mlp_kernel, n_layers=n_layers),
        out_shape=jax.ShapeDtypeStruct((Bp, dout_p), out_dtype),
        grid_spec=pltpu.PrefetchScalarGridSpec(
            num_scalar_prefetch=0,
            grid=(n_tiles,),
            in_specs=in_specs,
            out_specs=pl.BlockSpec((bt, dout_p), lambda i: (i, 0)),
        ),
        compiler_params=pltpu.CompilerParams(**cp_kwargs),
    )(*flat_inputs)

    # TODO(synk): downstream consumers could read the padded (Bp, dout_p)
    # buffer directly to skip this extra XLA slice on the critical path.
    return out_padded[:B, :dout]


def init_generator_params(key, embedding_dim, generator_dim, data_dim,
                          dtype=jnp.float32):
    """Deterministic synthetic parameters matching nn.Linear shapes.

    Each layer: W of shape (in, out)  [= torch weight.T], b of shape (out,).
    """
    dims = [embedding_dim] + list(generator_dim) + [data_dim]
    params = []
    for i in range(len(dims) - 1):
        key, kw, kb = jax.random.split(key, 3)
        fan_in = dims[i]
        bound = 1.0 / jnp.sqrt(fan_in)
        w = jax.random.uniform(kw, (dims[i], dims[i + 1]),
                               minval=-bound, maxval=bound, dtype=dtype)
        b = jax.random.uniform(kb, (dims[i + 1],),
                               minval=-bound, maxval=bound, dtype=dtype)
        params.append((w, b))
    return params


if __name__ == "__main__":
    # Shapes consistent with the module:
    #   embedding_dim=32, generator_dim=(64, 64), data_dim=16, batch=256.
    # batch=256 <= 1024 -> single-tile launch (grid=1).
    embedding_dim = 32
    generator_dim = (64, 64)
    data_dim = 16
    batch = 256

    key = jax.random.PRNGKey(0)
    key, kx = jax.random.split(key)
    x = jax.random.normal(kx, (batch, embedding_dim), dtype=jnp.float32)
    params = init_generator_params(key, embedding_dim, generator_dim, data_dim)

    # Reference check in plain JAX (same math as the PyTorch module).
    ref = x
    for li, (w, b) in enumerate(params):
        ref = ref @ w + b
        if li < len(params) - 1:
            ref = jnp.maximum(ref, 0.0)

    # f32-operand path (exact vs. reference).
    padded_f32 = pad_generator_params(params, operand_dtype=jnp.float32)
    out = jax.block_until_ready(generator_forward(x, padded_f32))
    assert out.shape == (batch, data_dim)
    assert jnp.allclose(out, ref, atol=1e-5, rtol=1e-5)

    # bf16-operand path (f32 accumulation + f32 bias/ReLU): halves HBM/DMA
    # bytes; checked against the f32 reference with a bf16-appropriate tol.
    padded_bf16 = pad_generator_params(params, operand_dtype=jnp.bfloat16)
    out_bf16 = jax.block_until_ready(generator_forward(x, padded_bf16))
    assert out_bf16.shape == (batch, data_dim)
    assert jnp.allclose(out_bf16, ref, atol=8e-2, rtol=8e-2)

    print("KERNEL_OK")
</pallas_src>

<mosaic_0001>
module attributes {stable_mosaic.version = 11 : i64} {
  func.func @_fused_mlp_kernel(%arg0: i32, %arg1: memref<256x128xf32, #tpu.memory_space<vmem>>, %arg2: memref<128x128xf32, #tpu.memory_space<vmem>>, %arg3: memref<1x128xf32, #tpu.memory_space<vmem>>, %arg4: memref<128x128xf32, #tpu.memory_space<vmem>>, %arg5: memref<1x128xf32, #tpu.memory_space<vmem>>, %arg6: memref<128x128xf32, #tpu.memory_space<vmem>>, %arg7: memref<1x128xf32, #tpu.memory_space<vmem>>, %arg8: memref<256x128xf32, #tpu.memory_space<vmem>>) attributes {dimension_semantics = [#tpu.dimension_semantics<parallel>], iteration_bounds = array<i64: 1>, scalar_prefetch = 0 : i64, scratch_operands = 0 : i64, tpu.core_type = #tpu.core_type<tc>, window_params = [{transform_indices = @transform_0, window_bounds = array<i64: 256, 128>}, {pipeline_mode = #tpu.pipeline_mode<synchronous>, transform_indices = @transform_1, window_bounds = array<i64: 128, 128>}, {pipeline_mode = #tpu.pipeline_mode<synchronous>, transform_indices = @transform_2, window_bounds = array<i64: 1, 128>}, {pipeline_mode = #tpu.pipeline_mode<synchronous>, transform_indices = @transform_3, window_bounds = array<i64: 128, 128>}, {pipeline_mode = #tpu.pipeline_mode<synchronous>, transform_indices = @transform_4, window_bounds = array<i64: 1, 128>}, {pipeline_mode = #tpu.pipeline_mode<synchronous>, transform_indices = @transform_5, window_bounds = array<i64: 128, 128>}, {pipeline_mode = #tpu.pipeline_mode<synchronous>, transform_indices = @transform_6, window_bounds = array<i64: 1, 128>}, {transform_indices = @transform_7, window_bounds = array<i64: 256, 128>}]} {
    %c0 = arith.constant 0 : index
    %c0_0 = arith.constant 0 : index
    %0 = vector.load %arg1[%c0, %c0_0] : memref<256x128xf32, #tpu.memory_space<vmem>>, vector<256x128xf32>
    %c0_1 = arith.constant 0 : index
    %c0_2 = arith.constant 0 : index
    %1 = vector.load %arg2[%c0_1, %c0_2] : memref<128x128xf32, #tpu.memory_space<vmem>>, vector<128x128xf32>
    %c0_3 = arith.constant 0 : index
    %c0_4 = arith.constant 0 : index
    %2 = vector.load %arg3[%c0_3, %c0_4] : memref<1x128xf32, #tpu.memory_space<vmem>>, vector<1x128xf32>
    %cst = arith.constant dense<0.000000e+00> : vector<256x128xf32>
    %3 = tpu.matmul %0, %1, %cst {dimension_numbers = #tpu.dot_dimension_numbers<[1], [0], [0], [1], [0, 0, 1, 1], [], []>} : vector<256x128xf32>, vector<128x128xf32>, vector<256x128xf32> -> vector<256x128xf32>
    %4 = vector.broadcast %2 : vector<1x128xf32> to vector<256x128xf32>
    %5 = arith.addf %3, %4 : vector<256x128xf32>
    %cst_5 = arith.constant 0.000000e+00 : f32
    %6 = vector.broadcast %cst_5 : f32 to vector<256x128xf32>
    %7 = arith.maximumf %5, %6 : vector<256x128xf32>
    %c0_6 = arith.constant 0 : index
    %c0_7 = arith.constant 0 : index
    %8 = vector.load %arg4[%c0_6, %c0_7] : memref<128x128xf32, #tpu.memory_space<vmem>>, vector<128x128xf32>
    %c0_8 = arith.constant 0 : index
    %c0_9 = arith.constant 0 : index
    %9 = vector.load %arg5[%c0_8, %c0_9] : memref<1x128xf32, #tpu.memory_space<vmem>>, vector<1x128xf32>
    %cst_10 = arith.constant dense<0.000000e+00> : vector<256x128xf32>
    %10 = tpu.matmul %7, %8, %cst_10 {dimension_numbers = #tpu.dot_dimension_numbers<[1], [0], [0], [1], [0, 0, 1, 1], [], []>} : vector<256x128xf32>, vector<128x128xf32>, vector<256x128xf32> -> vector<256x128xf32>
    %11 = vector.broadcast %9 : vector<1x128xf32> to vector<256x128xf32>
    %12 = arith.addf %10, %11 : vector<256x128xf32>
    %cst_11 = arith.constant 0.000000e+00 : f32
    %13 = vector.broadcast %cst_11 : f32 to vector<256x128xf32>
    %14 = arith.maximumf %12, %13 : vector<256x128xf32>
    %c0_12 = arith.constant 0 : index
    %c0_13 = arith.constant 0 : index
    %15 = vector.load %arg6[%c0_12, %c0_13] : memref<128x128xf32, #tpu.memory_space<vmem>>, vector<128x128xf32>
    %c0_14 = arith.constant 0 : index
    %c0_15 = arith.constant 0 : index
    %16 = vector.load %arg7[%c0_14, %c0_15] : memref<1x128xf32, #tpu.memory_space<vmem>>, vector<1x128xf32>
    %cst_16 = arith.constant dense<0.000000e+00> : vector<256x128xf32>
    %17 = tpu.matmul %14, %15, %cst_16 {dimension_numbers = #tpu.dot_dimension_numbers<[1], [0], [0], [1], [0, 0, 1, 1], [], []>} : vector<256x128xf32>, vector<128x128xf32>, vector<256x128xf32> -> vector<256x128xf32>
    %18 = vector.broadcast %16 : vector<1x128xf32> to vector<256x128xf32>
    %19 = arith.addf %17, %18 : vector<256x128xf32>
    %c0_17 = arith.constant 0 : index
    %c0_18 = arith.constant 0 : index
    %20 = vector.load %arg8[%c0_17, %c0_18] : memref<256x128xf32, #tpu.memory_space<vmem>>, vector<256x128xf32>
    tpu.vector_store %arg8[%c0_17, %c0_18], %19 {strides = array<i32>} : memref<256x128xf32, #tpu.memory_space<vmem>>, vector<256x128xf32>,
    return
  }
  func.func @transform_0(%arg0: i32) -> (i32, i32) {
    %c0_i32 = arith.constant 0 : i32
    %c0_i32_0 = arith.constant 0 : i32
    return %arg0, %c0_i32 : i32, i32
  }
  func.func @transform_1(%arg0: i32) -> (i32, i32) {
    %c0_i32 = arith.constant 0 : i32
    %c0_i32_0 = arith.constant 0 : i32
    %c0_i32_1 = arith.constant 0 : i32
    return %c0_i32, %c0_i32_0 : i32, i32
  }
  func.func @transform_2(%arg0: i32) -> (i32, i32) {
    %c0_i32 = arith.constant 0 : i32
    %c0_i32_0 = arith.constant 0 : i32
    %c0_i32_1 = arith.constant 0 : i32
    return %c0_i32, %c0_i32_0 : i32, i32
  }
  func.func @transform_3(%arg0: i32) -> (i32, i32) {
    %c0_i32 = arith.constant 0 : i32
    %c0_i32_0 = arith.constant 0 : i32
    %c0_i32_1 = arith.constant 0 : i32
    return %c0_i32, %c0_i32_0 : i32, i32
  }
  func.func @transform_4(%arg0: i32) -> (i32, i32) {
    %c0_i32 = arith.constant 0 : i32
    %c0_i32_0 = arith.constant 0 : i32
    %c0_i32_1 = arith.constant 0 : i32
    return %c0_i32, %c0_i32_0 : i32, i32
  }
  func.func @transform_5(%arg0: i32) -> (i32, i32) {
    %c0_i32 = arith.constant 0 : i32
    %c0_i32_0 = arith.constant 0 : i32
    %c0_i32_1 = arith.constant 0 : i32
    return %c0_i32, %c0_i32_0 : i32, i32
  }
  func.func @transform_6(%arg0: i32) -> (i32, i32) {
    %c0_i32 = arith.constant 0 : i32
    %c0_i32_0 = arith.constant 0 : i32
    %c0_i32_1 = arith.constant 0 : i32
    return %c0_i32, %c0_i32_0 : i32, i32
  }
  func.func @transform_7(%arg0: i32) -> (i32, i32) {
    %c0_i32 = arith.constant 0 : i32
    %c0_i32_0 = arith.constant 0 : i32
    return %arg0, %c0_i32 : i32, i32
  }
}

</mosaic_0001>

<bundles_post_ra>
// kernel: tpu_custom_call.1
= control target key start
LH: loop header
LB: loop body
LE: loop exit
PB: predicated region body
PF: predicated region fallthrough
CT: control target
= control target key end

     0   :  { %12 = vsyncpa [#allocation3], 0  ;;  %s1871_s0 = inlined_call_operand.hbm [shape: f32[256,128], index: 0, kind: input, shape index: {}]   ;;  %s1872_s1 = inlined_call_operand.hbm [shape: f32[128,128], index: 1, kind: input, shape index: {}]   ;;  %s1873_s2 = inlined_call_operand.vmem [shape: f32[1,128], index: 2, kind: input, shape index: {}]   ;;  %s1874_s3 = inlined_call_operand.hbm [shape: f32[128,128], index: 3, kind: input, shape index: {}]   ;;  %s1875_s4 = inlined_call_operand.vmem [shape: f32[1,128], index: 4, kind: input, shape index: {}]   ;;  %s1876_s5 = inlined_call_operand.hbm [shape: f32[128,128], index: 5, kind: input, shape index: {}]   ;;  %s1877_s6 = inlined_call_operand.vmem [shape: f32[1,128], index: 6, kind: input, shape index: {}]   ;;  %s1878_s7 = inlined_call_operand.hbm [shape: f32[256,128], index: 7, kind: output, shape index: {}]  }
   0x1   :  { %13 = vsyncpa [#allocation6], 0 }
   0x2   :  { %14 = vsyncpa [#allocation9], 0 }
   0x3   :  { %15 = vsyncpa [#allocation4], 0  ;;  %s1597_s24 = smov [#allocation5]   ;;  %s1598_s26 = smov [#allocation2]  }
   0x4   :  { %s33_s25 = sshll.u32 %s1597_s24, 4  ;;  %s21_s27 = sshll.u32 %s1598_s26, 4  ;;  %s34_s25 = int_to_ptr.vmem [resolvable:$true] %s33_s25  ;;  %s1644_s27 = int_to_ptr.vmem [resolvable:$true] %s21_s27 }
   0x5   :  { %s1479_s30 = scalar_lea.hbm %s1872_s1, 2048 }
   0x6   :  { %p1480_p0 = scmp.ne.s32.totalorder %s1872_s1, %s1479_s30  ;;  %p1483_p1 = scmp.lt.u32.totalorder %s1479_s30, %s1872_s1 }
   0x8   :  { %p1485_p2 = pnand %p1483_p1, %p1480_p0 }
   0xa   :  { %1488 = shalt.err (!%p1485_p2)
}
   0xb   :  { %s1489_s12 = scalar_lea.vmem %s34_s25, 2048  ;;  %p1494_p4 = scmp.lt.s32.totalorder %s34_s25, %s34_s25 }
   0xc   :  { %p1490_p3 = scmp.ne.s32.totalorder %s34_s25, %s1489_s12  ;;  %p1495_p5 = scmp.lt.s32.totalorder %s1489_s12, %s1489_s12 }
   0xe   :  { %p1496_p6 = por %p1495_p5, %p1494_p4 }
  0x10   :  { %p1497_p7 = pnand %p1496_p6, %p1490_p3 }
  0x12   :  { %1500 = shalt.err (!%p1497_p7)
}
  0x13   :  { %s1599_s13 = smov 128   ;;  %s1600_s14 = smov 8  }
  0x14   :  { %39 = dma.hbm_to_vmem [thread:$0]  %s1872_s1, 2048, %s34_s25, [#allocation6], %s1599_s13, %s1599_s13, %s1600_s14  }
  0x15   :  { %s1501_s19 = scalar_lea.hbm %s1871_s0, 4096 }
  0x16   :  { %p1502_p8 = scmp.ne.s32.totalorder %s1871_s0, %s1501_s19  ;;  %p1505_p9 = scmp.lt.u32.totalorder %s1501_s19, %s1871_s0 }
  0x18   :  { %p1507_p10 = pnand %p1505_p9, %p1502_p8 }
  0x1a   :  { %1510 = shalt.err (!%p1507_p10)
}
  0x1b   :  { %s1511_s24 = scalar_lea.vmem %s1644_s27, 4096  ;;  %p1516_p12 = scmp.lt.s32.totalorder %s1644_s27, %s1644_s27 }
  0x1c   :  { %p1512_p11 = scmp.ne.s32.totalorder %s1644_s27, %s1511_s24  ;;  %p1517_p13 = scmp.lt.s32.totalorder %s1511_s24, %s1511_s24 }
  0x1e   :  { %p1518_p0 = por %p1517_p13, %p1516_p12 }
  0x20   :  { %p1519_p1 = pnand %p1518_p0, %p1512_p11 }
  0x22   :  { %1522 = shalt.err (!%p1519_p1)
}
  0x23   :  { %27 = dma.hbm_to_vmem [thread:$0]  %s1871_s0, 4096, %s1644_s27, [#allocation3], %s1599_s13, %s1599_s13, %s1600_s14  }
  0x24   :  { %s1601_s26 = smov [#allocation7]   ;;  %s1602_s29 = smov [#allocation8]  }
  0x25   :  { %s47_s28 = sshll.u32 %s1601_s26, 4  ;;  %s61_s30 = sshll.u32 %s1602_s29, 4  ;;  %s48_s28 = int_to_ptr.vmem [resolvable:$true] %s47_s28  ;;  %s1681_s30 = int_to_ptr.vmem [resolvable:$true] %s61_s30 }
  0x26   :  { %s1523_s10 = scalar_lea.hbm %s1874_s3, 2048 }
  0x27   :  { %p1524_p2 = scmp.ne.s32.totalorder %s1874_s3, %s1523_s10  ;;  %p1527_p3 = scmp.lt.u32.totalorder %s1523_s10, %s1874_s3 }
  0x29   :  { %p1529_p4 = pnand %p1527_p3, %p1524_p2 }
  0x2b   :  { %1532 = shalt.err (!%p1529_p4)
}
  0x2c   :  { %s1533_s0 = scalar_lea.vmem %s48_s28, 2048  ;;  %p1538_p6 = scmp.lt.s32.totalorder %s48_s28, %s48_s28 }
  0x2d   :  { %p1534_p5 = scmp.ne.s32.totalorder %s48_s28, %s1533_s0  ;;  %p1539_p7 = scmp.lt.s32.totalorder %s1533_s0, %s1533_s0 }
  0x2f   :  { %p1540_p8 = por %p1539_p7, %p1538_p6 }
  0x31   :  { %p1541_p9 = pnand %p1540_p8, %p1534_p5 }
  0x33   :  { %1544 = shalt.err (!%p1541_p9)
}
  0x34   :  { %53 = dma.hbm_to_vmem [thread:$0]  %s1874_s3, 2048, %s48_s28, [#allocation6], %s1599_s13, %s1599_s13, %s1600_s14  }
  0x35   :  { %s1545_s20 = scalar_lea.hbm %s1876_s5, 2048 }
  0x36   :  { %p1546_p10 = scmp.ne.s32.totalorder %s1876_s5, %s1545_s20  ;;  %p1549_p11 = scmp.lt.u32.totalorder %s1545_s20, %s1876_s5 }
  0x38   :  { %p1551_p12 = pnand %p1549_p11, %p1546_p10 }
  0x3a   :  { %1554 = shalt.err (!%p1551_p12)
}
  0x3b   :  { %s1555_s1 = scalar_lea.vmem %s1681_s30, 2048  ;;  %p1560_p0 = scmp.lt.s32.totalorder %s1681_s30, %s1681_s30 }
  0x3c   :  { %p1556_p13 = scmp.ne.s32.totalorder %s1681_s30, %s1555_s1  ;;  %p1561_p1 = scmp.lt.s32.totalorder %s1555_s1, %s1555_s1 }
  0x3e   :  { %p1562_p2 = por %p1561_p1, %p1560_p0 }
  0x40   :  { %p1563_p3 = pnand %p1562_p2, %p1556_p13 }
  0x42   :  { %1566 = shalt.err (!%p1563_p3)
}
  0x43   :  { %67 = dma.hbm_to_vmem [thread:$0]  %s1876_s5, 2048, %s1681_s30, [#allocation9], %s1599_s13, %s1599_s13, %s1600_s14  }
  0x44   :  { %1589 = dma.done.wait [#allocation3], 4096  }
  0x45   :  { %1590 = vsyncadd [#allocation3], 4294963200 }
  0x46   :  { %1591 = dma.done.wait [#allocation6], 4096  }
  0x47   :  { %1592 = vsyncadd [#allocation6], 4294963200 }
  0x48   :  { %1593 = dma.done.wait [#allocation9], 2048  }
  0x49   :  { %1594 = vsyncadd [#allocation9], 4294965248  ;;  %v114_v0 = vld [vmem:[#allocation5] sm:$0xff]  ;;  %v115_v1 = vld [vmem:[#allocation5 + $0x8] sm:$0xff] }
  0x4a   :  { %v116_v2 = vld [vmem:[#allocation5 + $0x10] sm:$0xff]  ;;  %v1360_v3 = vpack.c.bf16 %v115_v1, %v114_v0  ;;  %v117_v4 = vld [vmem:[#allocation5 + $0x18] sm:$0xff]  ;;  %v118_v6 = vld [vmem:[#allocation5 + $0x20] sm:$0xff] }
  0x4b   :  { %v1364_v5 = vpack.c.bf16 %v117_v4, %v116_v2  ;;  %v119_v7 = vld [vmem:[#allocation5 + $0x28] sm:$0xff]  ;;  %v82_v9 = vld [vmem:[#allocation2] sm:$0xff]  ;;  %v120_v10 = vld [vmem:[#allocation5 + $0x30] sm:$0xff] }
  0x4c   :  { %1361 = vmatprep.subr.bf16.mxu0 %v1360_v3  ;;  %1456 = vmatprep.subr.bf16.mxu1 %v1360_v3  ;;  %v1368_v8 = vpack.c.bf16 %v119_v7, %v118_v6  ;;  %v121_v11 = vld [vmem:[#allocation5 + $0x38] sm:$0xff]  ;;  %v122_v13 = vld [vmem:[#allocation5 + $0x40] sm:$0xff]  ;;  %v123_v14 = vld [vmem:[#allocation5 + $0x48] sm:$0xff] }
  0x4d   :  { %1363 = vmatpush3.bf16.msra.mxu0 %v1360_v3  ;;  %1464 = vmatpush3.bf16.msra.mxu1 %v1360_v3  ;;  %v1372_v12 = vpack.c.bf16 %v121_v11, %v120_v10  ;;  %v98_v15 = vld [vmem:[#allocation2 + $0x80] sm:$0xff]  ;;  %v1376_v16 = vpack.c.bf16 %v123_v14, %v122_v13  ;;  %v124_v17 = vld [vmem:[#allocation5 + $0x50] sm:$0xff]  ;;  %v125_v18 = vld [vmem:[#allocation5 + $0x58] sm:$0xff] }
  0x4e   :  { %1365 = vmatprep.subr.bf16.mxu0 %v1364_v5  ;;  %1457 = vmatprep.subr.bf16.mxu1 %v1364_v5  ;;  %v1380_v19 = vpack.c.bf16 %v125_v18, %v124_v17  ;;  %v126_v20 = vld [vmem:[#allocation5 + $0x60] sm:$0xff]  ;;  %v127_v21 = vld [vmem:[#allocation5 + $0x68] sm:$0xff]  ;;  %v128_v23 = vld [vmem:[#allocation5 + $0x70] sm:$0xff] }
  0x4f   :  { %1152 = vmatprep.mubr.f32.mxu0 %v82_v9  ;;  %1176 = vmatprep.mubr.f32.mxu1 %v98_v15  ;;  %v1384_v22 = vpack.c.bf16 %v127_v21, %v126_v20  ;;  %v129_v24 = vld [vmem:[#allocation5 + $0x78] sm:$0xff]  ;;  %v394_v26 = vld [vmem:[#allocation7] sm:$0xff]  ;;  %v395_v27 = vld [vmem:[#allocation7 + $0x8] sm:$0xff] }
  0x50   :  { %v1388_v25 = vpack.c.bf16 %v129_v24, %v128_v23  ;;  %v1392_v28 = vpack.c.bf16 %v395_v27, %v394_v26  ;;  %v396_v29 = vld [vmem:[#allocation7 + $0x10] sm:$0xff]  ;;  %v397_v30 = vld [vmem:[#allocation7 + $0x18] sm:$0xff]  ;;  %v83_v31 = vld [vmem:[#allocation2 + $0x8] sm:$0xff] }
  0x51   :  { %1367 = vmatpush3.bf16.msra.mxu0 %v1364_v5  ;;  %1465 = vmatpush3.bf16.msra.mxu1 %v1364_v5  ;;  %v99_v32 = vld [vmem:[#allocation2 + $0x88] sm:$0xff]  ;;  %v84_v33 = vld [vmem:[#allocation2 + $0x10] sm:$0xff]  ;;  %v1396_v35 = vpack.c.bf16 %v397_v30, %v396_v29  ;;  %v398_v36 = vld [vmem:[#allocation7 + $0x20] sm:$0xff] }
  0x52   :  { %1369 = vmatprep.subr.bf16.mxu0 %v1368_v8  ;;  %1458 = vmatprep.subr.bf16.mxu1 %v1368_v8  ;;  %v100_v34 = vld [vmem:[#allocation2 + $0x90] sm:$0xff]  ;;  %v399_v37 = vld [vmem:[#allocation7 + $0x28] sm:$0xff]  ;;  %v85_v38 = vld [vmem:[#allocation2 + $0x18] sm:$0xff] }
  0x53   :  { %v101_v39 = vld [vmem:[#allocation2 + $0x98] sm:$0xff]  ;;  %v86_v40 = vld [vmem:[#allocation2 + $0x20] sm:$0xff]  ;;  %v1400_v42 = vpack.c.bf16 %v399_v37, %v398_v36  ;;  %v400_v43 = vld [vmem:[#allocation7 + $0x30] sm:$0xff] }
  0x54   :  { %v102_v41 = vld [vmem:[#allocation2 + $0xa0] sm:$0xff]  ;;  %v401_v44 = vld [vmem:[#allocation7 + $0x38] sm:$0xff]  ;;  %v87_v45 = vld [vmem:[#allocation2 + $0x28] sm:$0xff] }
  0x55   :  { %1371 = vmatpush3.bf16.msra.mxu0 %v1368_v8  ;;  %1466 = vmatpush3.bf16.msra.mxu1 %v1368_v8  ;;  %v103_v46 = vld [vmem:[#allocation2 + $0xa8] sm:$0xff]  ;;  %v88_v47 = vld [vmem:[#allocation2 + $0x30] sm:$0xff]  ;;  %v1404_v49 = vpack.c.bf16 %v401_v44, %v400_v43  ;;  %v402_v50 = vld [vmem:[#allocation7 + $0x40] sm:$0xff] }
  0x56   :  { %1373 = vmatprep.subr.bf16.mxu0 %v1372_v12  ;;  %1459 = vmatprep.subr.bf16.mxu1 %v1372_v12  ;;  %v104_v48 = vld [vmem:[#allocation2 + $0xb0] sm:$0xff]  ;;  %v403_v51 = vld [vmem:[#allocation7 + $0x48] sm:$0xff]  ;;  %v89_v52 = vld [vmem:[#allocation2 + $0x38] sm:$0xff] }
  0x57   :  { %v105_v53 = vld [vmem:[#allocation2 + $0xb8] sm:$0xff]  ;;  %v90_v54 = vld [vmem:[#allocation2 + $0x40] sm:$0xff]  ;;  %v1408_v56 = vpack.c.bf16 %v403_v51, %v402_v50  ;;  %v404_v57 = vld [vmem:[#allocation7 + $0x50] sm:$0xff] }
  0x58   :  { %v106_v55 = vld [vmem:[#allocation2 + $0xc0] sm:$0xff]  ;;  %v405_v58 = vld [vmem:[#allocation7 + $0x58] sm:$0xff]  ;;  %v91_v59 = vld [vmem:[#allocation2 + $0x48] sm:$0xff] }
  0x59   :  { %1375 = vmatpush3.bf16.msra.mxu0 %v1372_v12  ;;  %1467 = vmatpush3.bf16.msra.mxu1 %v1372_v12  ;;  %v107_v60 = vld [vmem:[#allocation2 + $0xc8] sm:$0xff]  ;;  %v92_v61 = vld [vmem:[#allocation2 + $0x50] sm:$0xff]  ;;  %v1412_v63 = vpack.c.bf16 %v405_v58, %v404_v57  ;;  %v406_v0 = vld [vmem:[#allocation7 + $0x60] sm:$0xff] }
  0x5a   :  { %1377 = vmatprep.subr.bf16.mxu0 %v1376_v16  ;;  %1460 = vmatprep.subr.bf16.mxu1 %v1376_v16  ;;  %v108_v62 = vld [vmem:[#allocation2 + $0xd0] sm:$0xff]  ;;  %v407_v1 = vld [vmem:[#allocation7 + $0x68] sm:$0xff]  ;;  %v93_v2 = vld [vmem:[#allocation2 + $0x58] sm:$0xff] }
  0x5b   :  { %v109_v3 = vld [vmem:[#allocation2 + $0xd8] sm:$0xff]  ;;  %v94_v4 = vld [vmem:[#allocation2 + $0x60] sm:$0xff]  ;;  %v1416_v6 = vpack.c.bf16 %v407_v1, %v406_v0  ;;  %v95_v7 = vld [vmem:[#allocation2 + $0x68] sm:$0xff] }
  0x5c   :  { %v110_v5 = vld [vmem:[#allocation2 + $0xe0] sm:$0xff]  ;;  %v111_v8 = vld [vmem:[#allocation2 + $0xe8] sm:$0xff]  ;;  %v96_v9 = vld [vmem:[#allocation2 + $0x70] sm:$0xff] }
  0x5d   :  { %1379 = vmatpush3.bf16.msra.mxu0 %v1376_v16  ;;  %1468 = vmatpush3.bf16.msra.mxu1 %v1376_v16  ;;  %v112_v10 = vld [vmem:[#allocation2 + $0xf0] sm:$0xff]  ;;  %v97_v11 = vld [vmem:[#allocation2 + $0x78] sm:$0xff]  ;;  %v674_v16 = vld [vmem:[#allocation8] sm:$0xff] }
  0x5e   :  { %1381 = vmatprep.subr.bf16.mxu0 %v1380_v19  ;;  %1461 = vmatprep.subr.bf16.mxu1 %v1380_v19  ;;  %v113_v12 = vld [vmem:[#allocation2 + $0xf8] sm:$0xff]  ;;  %v408_v13 = vld [vmem:[#allocation7 + $0x70] sm:$0xff]  ;;  %v675_v17 = vld [vmem:[#allocation8 + $0x8] sm:$0xff] }
  0x5f   :  { %v409_v14 = vld [vmem:[#allocation7 + $0x78] sm:$0xff]  ;;  %v676_v18 = vld [vmem:[#allocation8 + $0x10] sm:$0xff]  ;;  %v679_v23 = vld [vmem:[#allocation8 + $0x28] sm:$0xff] }
  0x60   :  { %v1420_v15 = vpack.c.bf16 %v409_v14, %v408_v13  ;;  %v677_v20 = vld [vmem:[#allocation8 + $0x18] sm:$0xff]  ;;  %v683_v29 = vld [vmem:[#allocation8 + $0x48] sm:$0xff]  ;;  %v1721_v37 = vld [vmem:[%s1873_s2] ss:$0 sm:$0xff] }
  0x61   :  { %1383 = vmatpush3.bf16.msra.mxu0 %v1380_v19  ;;  %1469 = vmatpush3.bf16.msra.mxu1 %v1380_v19  ;;  %v1424_v19 = vpack.c.bf16 %v675_v17, %v674_v16  ;;  %v1428_v21 = vpack.c.bf16 %v677_v20, %v676_v18  ;;  %v681_v26 = vld [vmem:[#allocation8 + $0x38] sm:$0xff] }
  0x62   :  { %1385 = vmatprep.subr.bf16.mxu0 %v1384_v22  ;;  %1462 = vmatprep.subr.bf16.mxu1 %v1384_v22 }
  0x65   :  { %1387 = vmatpush3.bf16.msra.mxu0 %v1384_v22  ;;  %1470 = vmatpush3.bf16.msra.mxu1 %v1384_v22  ;;  %v678_v22 = vld [vmem:[#allocation8 + $0x20] sm:$0xff] }
  0x66   :  { %1389 = vmatprep.subr.bf16.mxu0 %v1388_v25  ;;  %1463 = vmatprep.subr.bf16.mxu1 %v1388_v25  ;;  %v1432_v24 = vpack.c.bf16 %v679_v23, %v678_v22 }
  0x69   :  { %1391 = vmatpush3.bf16.msra.mxu0 %v1388_v25  ;;  %1471 = vmatpush3.bf16.msra.mxu1 %v1388_v25  ;;  %v680_v25 = vld [vmem:[#allocation8 + $0x30] sm:$0xff] }
  0x6a   :  { %1393 = vmatprep.subr.bf16.mxu1 %v1392_v28  ;;  %1425 = vmatprep.subr.bf16.mxu0 %v1424_v19  ;;  %v1436_v27 = vpack.c.bf16 %v681_v26, %v680_v25 }
  0x6c   :  { %1153 = vmatmul.mubr.f32.vlgmr.msra.gmra.mrb[0].mxu0 %v83_v31  ;;  %1177 = vmatmul.mubr.f32.vlgmr.msra.gmra.mrb[0].mxu1 %v99_v32  ;;  %v684_v31 = vld [vmem:[#allocation8 + $0x50] sm:$0xff]  ;;  %v685_v32 = vld [vmem:[#allocation8 + $0x58] sm:$0xff] }
  0x6d   :  { %1155 = vmatprep.mubr.f32.mxu0 %v84_v33  ;;  %1179 = vmatprep.mubr.f32.mxu1 %v100_v34  ;;  %v1444_v33 = vpack.c.bf16 %v685_v32, %v684_v31  ;;  %v686_v34 = vld [vmem:[#allocation8 + $0x60] sm:$0xff] }
  0x6e   :  { %1395 = vmatpush3.bf16.msra.mxu1 %v1392_v28  ;;  %1427 = vmatpush3.bf16.msra.mxu0 %v1424_v19  ;;  %v682_v28 = vld [vmem:[#allocation8 + $0x40] sm:$0xff] }
  0x6f   :  { %1397 = vmatprep.subr.bf16.mxu1 %v1396_v35  ;;  %1429 = vmatprep.subr.bf16.mxu0 %v1428_v21  ;;  %v1440_v30 = vpack.c.bf16 %v683_v29, %v682_v28 }
  0x70   :  { %1156 = vmatmul.mubr.f32.gmra.mrb[2].mxu0 %v85_v38  ;;  %1180 = vmatmul.mubr.f32.gmra.mrb[2].mxu1 %v101_v39 }
  0x71   :  { %1158 = vmatprep.mubr.f32.mxu0 %v86_v40  ;;  %1182 = vmatprep.mubr.f32.mxu1 %v102_v41 }
  0x72   :  { %1399 = vmatpush3.bf16.msra.mxu1 %v1396_v35  ;;  %1431 = vmatpush3.bf16.msra.mxu0 %v1428_v21  ;;  %v687_v35 = vld [vmem:[#allocation8 + $0x68] sm:$0xff] }
  0x73   :  { %1401 = vmatprep.subr.bf16.mxu1 %v1400_v42  ;;  %1433 = vmatprep.subr.bf16.mxu0 %v1432_v24  ;;  %v1448_v36 = vpack.c.bf16 %v687_v35, %v686_v34 }
  0x74   :  { %1159 = vmatmul.mubr.f32.gmra.mrb[4].mxu0 %v87_v45  ;;  %1183 = vmatmul.mubr.f32.gmra.mrb[4].mxu1 %v103_v46 }
  0x75   :  { %1161 = vmatprep.mubr.f32.mxu0 %v88_v47  ;;  %1185 = vmatprep.mubr.f32.mxu1 %v104_v48 }
  0x76   :  { %1403 = vmatpush3.bf16.msra.mxu1 %v1400_v42  ;;  %1435 = vmatpush3.bf16.msra.mxu0 %v1432_v24 }
  0x77   :  { %1405 = vmatprep.subr.bf16.mxu1 %v1404_v49  ;;  %1437 = vmatprep.subr.bf16.mxu0 %v1436_v27 }
  0x78   :  { %1162 = vmatmul.mubr.f32.gmra.mrb[6].mxu0 %v89_v52  ;;  %1186 = vmatmul.mubr.f32.gmra.mrb[6].mxu1 %v105_v53 }
  0x79   :  { %1164 = vmatprep.mubr.f32.mxu0 %v90_v54  ;;  %1188 = vmatprep.mubr.f32.mxu1 %v106_v55 }
  0x7a   :  { %1407 = vmatpush3.bf16.msra.mxu1 %v1404_v49  ;;  %1439 = vmatpush3.bf16.msra.mxu0 %v1436_v27 }
  0x7b   :  { %1409 = vmatprep.subr.bf16.mxu1 %v1408_v56  ;;  %1441 = vmatprep.subr.bf16.mxu0 %v1440_v30 }
  0x7c   :  { %1165 = vmatmul.mubr.f32.gmra.mrb[8].mxu0 %v91_v59  ;;  %1189 = vmatmul.mubr.f32.gmra.mrb[8].mxu1 %v107_v60 }
  0x7d   :  { %1167 = vmatprep.mubr.f32.mxu0 %v92_v61  ;;  %1191 = vmatprep.mubr.f32.mxu1 %v108_v62 }
  0x7e   :  { %1411 = vmatpush3.bf16.msra.mxu1 %v1408_v56  ;;  %1443 = vmatpush3.bf16.msra.mxu0 %v1440_v30 }
  0x7f   :  { %1413 = vmatprep.subr.bf16.mxu1 %v1412_v63  ;;  %1445 = vmatprep.subr.bf16.mxu0 %v1444_v33 }
  0x80   :  { %1168 = vmatmul.mubr.f32.gmra.mrb[10].mxu0 %v93_v2  ;;  %1192 = vmatmul.mubr.f32.gmra.mrb[10].mxu1 %v109_v3 }
  0x81   :  { %1170 = vmatprep.mubr.f32.mxu0 %v94_v4  ;;  %1194 = vmatprep.mubr.f32.mxu1 %v110_v5 }
  0x82   :  { %1415 = vmatpush3.bf16.msra.mxu1 %v1412_v63  ;;  %1447 = vmatpush3.bf16.msra.mxu0 %v1444_v33 }
  0x83   :  { %1417 = vmatprep.subr.bf16.mxu1 %v1416_v6  ;;  %1449 = vmatprep.subr.bf16.mxu0 %v1448_v36 }
  0x84   :  { %1171 = vmatmul.mubr.f32.gmra.mrb[12].mxu0 %v95_v7  ;;  %1195 = vmatmul.mubr.f32.gmra.mrb[12].mxu1 %v111_v8 }
  0x85   :  { %1173 = vmatprep.mubr.f32.mxu0 %v96_v9  ;;  %1197 = vmatprep.mubr.f32.mxu1 %v112_v10 }
  0x86   :  { %1419 = vmatpush3.bf16.msra.mxu1 %v1416_v6  ;;  %1451 = vmatpush3.bf16.msra.mxu0 %v1448_v36 }
  0x87   :  { %1421 = vmatprep.subr.bf16.mxu1 %v1420_v15 }
  0x88   :  { %1174 = vmatmul.mubr.f32.gmra.mrb[14].mxu0 %v97_v11  ;;  %1198 = vmatmul.mubr.f32.gmra.mrb[14].mxu1 %v113_v12 }
  0x8a   :  { %1423 = vmatpush3.bf16.msra.mxu1 %v1420_v15 }
 0x13f   :  { %v1154_v38 = vpop.f32.mrb[0].mxu0  ;;  %v1723_v39 = vpop.f32.mrb[0].mxu1 }
 0x140   :  { %v209_v40 = vadd.f32 %v1154_v38, %v1721_v37  ;;  %v203_v41 = vpop.f32.mrb[1].mxu0  ;;  %v1726_v42 = vpop.f32.mrb[1].mxu1 }
 0x141   :  { %v204_v43 = vadd.f32 %v1721_v37, %v203_v41  ;;  %v284_v30 = vadd.f32 %v1721_v37, %v1726_v42 }
 0x142   :  { %v363_v47 = vmax.f32 %v209_v40, 0.0 }
 0x143   :  { %v362_v44 = vmax.f32 %v204_v43, 0.0  ;;  %v1157_v45 = vpop.f32.mrb[2].mxu0  ;;  %v1729_v46 = vpop.f32.mrb[2].mxu1  ;;  %v378_v40 = vmax.f32 %v284_v30, 0.0 }
 0x144   :  { %v219_v48 = vadd.f32 %v1157_v45, %v1721_v37  ;;  %v213_v49 = vpop.f32.mrb[3].mxu0  ;;  %v1732_v50 = vpop.f32.mrb[3].mxu1 }
 0x145   :  { %v214_v51 = vadd.f32 %v1721_v37, %v213_v49  ;;  %1232 = vmatprep.mubr.f32.mxu1 %v362_v44  ;;  %v294_v41 = vadd.f32 %v1721_v37, %v1732_v50  ;;  %v289_v44 = vadd.f32 %v1723_v39, %v1721_v37 }
 0x146   :  { %1233 = vmatmul.mubr.f32.vlgmr.msra.gmra.mrb[16].mxu1 %v363_v47  ;;  %v365_v55 = vmax.f32 %v219_v48, 0.0  ;;  %v299_v48 = vadd.f32 %v1729_v46, %v1721_v37 }
 0x147   :  { %v364_v52 = vmax.f32 %v214_v51, 0.0  ;;  %v1160_v53 = vpop.f32.mrb[4].mxu0  ;;  %v1735_v54 = vpop.f32.mrb[4].mxu1  ;;  %v380_v42 = vmax.f32 %v294_v41, 0.0  ;;  %v379_v47 = vmax.f32 %v289_v44, 0.0 }
 0x148   :  { %v229_v56 = vadd.f32 %v1160_v53, %v1721_v37  ;;  %v223_v57 = vpop.f32.mrb[5].mxu0  ;;  %v1738_v58 = vpop.f32.mrb[5].mxu1  ;;  %v381_v51 = vmax.f32 %v299_v48, 0.0  ;;  %v309_v39 = vadd.f32 %v1735_v54, %v1721_v37 }
 0x149   :  { %v224_v59 = vadd.f32 %v1721_v37, %v223_v57  ;;  %1235 = vmatprep.mubr.f32.mxu1 %v364_v52  ;;  %v304_v45 = vadd.f32 %v1721_v37, %v1738_v58 }
 0x14a   :  { %1236 = vmatmul.mubr.f32.gmra.mrb[18].mxu1 %v365_v55  ;;  %v367_v63 = vmax.f32 %v229_v56, 0.0  ;;  %v383_v55 = vmax.f32 %v309_v39, 0.0 }
 0x14b   :  { %v366_v60 = vmax.f32 %v224_v59, 0.0  ;;  %v1163_v61 = vpop.f32.mrb[6].mxu0  ;;  %v1741_v62 = vpop.f32.mrb[6].mxu1  ;;  %v382_v49 = vmax.f32 %v304_v45, 0.0 }
 0x14c   :  { %v239_v0 = vadd.f32 %v1163_v61, %v1721_v37  ;;  %v233_v1 = vpop.f32.mrb[7].mxu0  ;;  %v313_v2 = vpop.f32.mrb[7].mxu1  ;;  %v319_v56 = vadd.f32 %v1741_v62, %v1721_v37 }
 0x14d   :  { %v234_v3 = vadd.f32 %v1721_v37, %v233_v1  ;;  %1238 = vmatprep.mubr.f32.mxu1 %v366_v60  ;;  %v314_v50 = vadd.f32 %v1721_v37, %v313_v2 }
 0x14e   :  { %1239 = vmatmul.mubr.f32.gmra.mrb[20].mxu1 %v367_v63  ;;  %v369_v7 = vmax.f32 %v239_v0, 0.0  ;;  %v385_v58 = vmax.f32 %v319_v56, 0.0 }
 0x14f   :  { %v368_v4 = vmax.f32 %v234_v3, 0.0  ;;  %v1166_v5 = vpop.f32.mrb[8].mxu0  ;;  %v1745_v6 = vpop.f32.mrb[8].mxu1  ;;  %v384_v52 = vmax.f32 %v314_v50, 0.0 }
 0x150   :  { %v249_v8 = vadd.f32 %v1166_v5, %v1721_v37  ;;  %v243_v9 = vpop.f32.mrb[9].mxu0  ;;  %v323_v10 = vpop.f32.mrb[9].mxu1  ;;  %v329_v59 = vadd.f32 %v1745_v6, %v1721_v37 }
 0x151   :  { %v244_v11 = vadd.f32 %v1721_v37, %v243_v9  ;;  %1241 = vmatprep.mubr.f32.mxu1 %v368_v4  ;;  %v324_v53 = vadd.f32 %v1721_v37, %v323_v10  ;;  %v1785_v10 = vld [vmem:[%s1875_s4] ss:$0 sm:$0xff] }
 0x152   :  { %1242 = vmatmul.mubr.f32.gmra.mrb[22].mxu1 %v369_v7  ;;  %v371_v15 = vmax.f32 %v249_v8, 0.0  ;;  %v387_v61 = vmax.f32 %v329_v59, 0.0  ;;  %v688_v7 = vld [vmem:[#allocation8 + $0x70] sm:$0xff]  ;;  %v689_v8 = vld [vmem:[#allocation8 + $0x78] sm:$0xff] }
 0x153   :  { %v370_v12 = vmax.f32 %v244_v11, 0.0  ;;  %v1169_v13 = vpop.f32.mrb[10].mxu0  ;;  %v1749_v14 = vpop.f32.mrb[10].mxu1  ;;  %v386_v46 = vmax.f32 %v324_v53, 0.0  ;;  %v1452_v9 = vpack.c.bf16 %v689_v8, %v688_v7 }
 0x154   :  { %v259_v16 = vadd.f32 %v1169_v13, %v1721_v37  ;;  %v253_v17 = vpop.f32.mrb[11].mxu0  ;;  %v333_v18 = vpop.f32.mrb[11].mxu1  ;;  %v339_v63 = vadd.f32 %v1749_v14, %v1721_v37 }
 0x155   :  { %v254_v19 = vadd.f32 %v1721_v37, %v253_v17  ;;  %1244 = vmatprep.mubr.f32.mxu1 %v370_v12  ;;  %v334_v57 = vadd.f32 %v1721_v37, %v333_v18  ;;  %1453 = vmatprep.subr.bf16.mxu0 %v1452_v9 }
 0x156   :  { %1245 = vmatmul.mubr.f32.gmra.mrb[24].mxu1 %v371_v15  ;;  %v373_v23 = vmax.f32 %v259_v16, 0.0  ;;  %v389_v1 = vmax.f32 %v339_v63, 0.0  ;;  %1455 = vmatpush3.bf16.msra.mxu0 %v1452_v9 }
 0x157   :  { %v372_v20 = vmax.f32 %v254_v19, 0.0  ;;  %v1172_v21 = vpop.f32.mrb[12].mxu0  ;;  %v1196_v22 = vpop.f32.mrb[12].mxu1  ;;  %v388_v54 = vmax.f32 %v334_v57, 0.0 }
 0x158   :  { %v269_v24 = vadd.f32 %v1172_v21, %v1721_v37  ;;  %v263_v25 = vpop.f32.mrb[13].mxu0  ;;  %v343_v26 = vpop.f32.mrb[13].mxu1  ;;  %v349_v2 = vadd.f32 %v1196_v22, %v1721_v37 }
 0x159   :  { %v264_v27 = vadd.f32 %v1721_v37, %v263_v25  ;;  %1247 = vmatprep.mubr.f32.mxu1 %v372_v20  ;;  %v344_v60 = vadd.f32 %v1721_v37, %v343_v26 }
 0x15a   :  { %1248 = vmatmul.mubr.f32.gmra.mrb[26].mxu1 %v373_v23  ;;  %v375_v32 = vmax.f32 %v269_v24, 0.0  ;;  %v391_v4 = vmax.f32 %v349_v2, 0.0 }
 0x15b   :  { %v374_v28 = vmax.f32 %v264_v27, 0.0  ;;  %v1175_v29 = vpop.f32.mrb[14].mxu0  ;;  %v1199_v31 = vpop.f32.mrb[14].mxu1  ;;  %v390_v62 = vmax.f32 %v344_v60, 0.0 }
 0x15c   :  { %v279_v33 = vadd.f32 %v1175_v29, %v1721_v37  ;;  %v273_v34 = vpop.f32.mrb[15].mxu0  ;;  %v353_v35 = vpop.f32.mrb[15].mxu1  ;;  %v359_v5 = vadd.f32 %v1199_v31, %v1721_v37 }
 0x15d   :  { %v274_v36 = vadd.f32 %v1721_v37, %v273_v34  ;;  %1250 = vmatprep.mubr.f32.mxu1 %v374_v28  ;;  %v354_v0 = vadd.f32 %v1721_v37, %v353_v35 }
 0x15e   :  { %1251 = vmatmul.mubr.f32.gmra.mrb[28].mxu1 %v375_v32  ;;  %v377_v43 = vmax.f32 %v279_v33, 0.0  ;;  %v393_v6 = vmax.f32 %v359_v5, 0.0 }
 0x15f   :  { %v376_v38 = vmax.f32 %v274_v36, 0.0  ;;  %v392_v3 = vmax.f32 %v354_v0, 0.0 }
 0x161   :  { %1253 = vmatprep.mubr.f32.mxu1 %v376_v38 }
 0x162   :  { %1254 = vmatmul.mubr.f32.gmra.mrb[30].mxu1 %v377_v43 }
 0x163   :  { %1256 = vmatprep.mubr.f32.mxu1 %v378_v40 }
 0x166   :  { %1257 = vmatmul.mubr.f32.gmra.mrb[32].mxu1 %v379_v47 }
 0x167   :  { %1259 = vmatprep.mubr.f32.mxu1 %v380_v42 }
 0x16a   :  { %1260 = vmatmul.mubr.f32.gmra.mrb[34].mxu1 %v381_v51 }
 0x16b   :  { %1262 = vmatprep.mubr.f32.mxu1 %v382_v49 }
 0x16e   :  { %1263 = vmatmul.mubr.f32.gmra.mrb[36].mxu1 %v383_v55 }
 0x16f   :  { %1265 = vmatprep.mubr.f32.mxu1 %v384_v52 }
 0x172   :  { %1266 = vmatmul.mubr.f32.gmra.mrb[38].mxu1 %v385_v58 }
 0x173   :  { %1268 = vmatprep.mubr.f32.mxu1 %v386_v46 }
 0x176   :  { %1269 = vmatmul.mubr.f32.gmra.mrb[40].mxu1 %v387_v61 }
 0x177   :  { %1271 = vmatprep.mubr.f32.mxu1 %v388_v54 }
 0x17a   :  { %1272 = vmatmul.mubr.f32.gmra.mrb[42].mxu1 %v389_v1 }
 0x17b   :  { %1274 = vmatprep.mubr.f32.mxu1 %v390_v62 }
 0x17e   :  { %1275 = vmatmul.mubr.f32.gmra.mrb[44].mxu1 %v391_v4 }
 0x17f   :  { %1277 = vmatprep.mubr.f32.mxu1 %v392_v3 }
 0x182   :  { %1278 = vmatmul.mubr.f32.gmra.mrb[46].mxu1 %v393_v6 }
 0x219   :  { %v1234_v11 = vpop.f32.mrb[16].mxu1 }
 0x21a   :  { %v489_v12 = vadd.f32 %v1234_v11, %v1785_v10  ;;  %v483_v13 = vpop.f32.mrb[17].mxu1 }
 0x21b   :  { %v484_v37 = vadd.f32 %v1785_v10, %v483_v13 }
 0x21c   :  { %v643_v16 = vmax.f32 %v489_v12, 0.0 }
 0x21d   :  { %v642_v14 = vmax.f32 %v484_v37, 0.0  ;;  %v1237_v15 = vpop.f32.mrb[18].mxu1 }
 0x21e   :  { %v499_v17 = vadd.f32 %v1237_v15, %v1785_v10  ;;  %v493_v18 = vpop.f32.mrb[19].mxu1 }
 0x21f   :  { %v494_v19 = vadd.f32 %v1785_v10, %v493_v18  ;;  %1312 = vmatprep.mubr.f32.mxu0 %v642_v14 }
 0x220   :  { %1313 = vmatmul.mubr.f32.vlgmr.msra.gmra.mrb[16].mxu0 %v643_v16  ;;  %v645_v22 = vmax.f32 %v499_v17, 0.0 }
 0x221   :  { %v644_v20 = vmax.f32 %v494_v19, 0.0  ;;  %v1240_v21 = vpop.f32.mrb[20].mxu1 }
 0x222   :  { %v509_v23 = vadd.f32 %v1240_v21, %v1785_v10  ;;  %v503_v24 = vpop.f32.mrb[21].mxu1 }
 0x223   :  { %v504_v25 = vadd.f32 %v1785_v10, %v503_v24  ;;  %1315 = vmatprep.mubr.f32.mxu0 %v644_v20 }
 0x224   :  { %1316 = vmatmul.mubr.f32.gmra.mrb[18].mxu0 %v645_v22  ;;  %v647_v28 = vmax.f32 %v509_v23, 0.0 }
 0x225   :  { %v646_v26 = vmax.f32 %v504_v25, 0.0  ;;  %v1243_v27 = vpop.f32.mrb[22].mxu1 }
 0x226   :  { %v519_v29 = vadd.f32 %v1243_v27, %v1785_v10  ;;  %v513_v30 = vpop.f32.mrb[23].mxu1 }
 0x227   :  { %v514_v31 = vadd.f32 %v1785_v10, %v513_v30  ;;  %1318 = vmatprep.mubr.f32.mxu0 %v646_v26 }
 0x228   :  { %1319 = vmatmul.mubr.f32.gmra.mrb[20].mxu0 %v647_v28  ;;  %v649_v34 = vmax.f32 %v519_v29, 0.0 }
 0x229   :  { %v648_v32 = vmax.f32 %v514_v31, 0.0  ;;  %v1246_v33 = vpop.f32.mrb[24].mxu1 }
 0x22a   :  { %v529_v35 = vadd.f32 %v1246_v33, %v1785_v10  ;;  %v523_v36 = vpop.f32.mrb[25].mxu1 }
 0x22b   :  { %v524_v38 = vadd.f32 %v1785_v10, %v523_v36  ;;  %1321 = vmatprep.mubr.f32.mxu0 %v648_v32 }
 0x22c   :  { %1322 = vmatmul.mubr.f32.gmra.mrb[22].mxu0 %v649_v34  ;;  %v651_v43 = vmax.f32 %v529_v35, 0.0 }
 0x22d   :  { %v650_v40 = vmax.f32 %v524_v38, 0.0  ;;  %v1249_v41 = vpop.f32.mrb[26].mxu1 }
 0x22e   :  { %v539_v44 = vadd.f32 %v1249_v41, %v1785_v10  ;;  %v533_v42 = vpop.f32.mrb[27].mxu1 }
 0x22f   :  { %v534_v45 = vadd.f32 %v1785_v10, %v533_v42  ;;  %1324 = vmatprep.mubr.f32.mxu0 %v650_v40 }
 0x230   :  { %1325 = vmatmul.mubr.f32.gmra.mrb[24].mxu0 %v651_v43  ;;  %v653_v49 = vmax.f32 %v539_v44, 0.0 }
 0x231   :  { %v652_v47 = vmax.f32 %v534_v45, 0.0  ;;  %v1252_v48 = vpop.f32.mrb[28].mxu1  ;;  %v1822_v45 = vld [vmem:[%s1877_s6] ss:$0 sm:$0xff]  ;;  %s1603_s6 = smov [#allocation10]  }
 0x232   :  { %v549_v50 = vadd.f32 %v1252_v48, %v1785_v10  ;;  %v543_v51 = vpop.f32.mrb[29].mxu1  ;;  %s959_s30 = sshll.u32 %s1603_s6, 4  ;;  %s960_s30 = int_to_ptr.vmem [resolvable:$true] %s959_s30 }
 0x233   :  { %v544_v39 = vadd.f32 %v1785_v10, %v543_v51  ;;  %1327 = vmatprep.mubr.f32.mxu0 %v652_v47  ;;  %s1567_s8 = scalar_lea.vmem %s960_s30, 4096  ;;  %p1572_p5 = scmp.lt.s32.totalorder %s960_s30, %s960_s30 }
 0x234   :  { %1328 = vmatmul.mubr.f32.gmra.mrb[26].mxu0 %v653_v49  ;;  %v655_v55 = vmax.f32 %v549_v50, 0.0  ;;  %p1568_p4 = scmp.ne.s32.totalorder %s960_s30, %s1567_s8  ;;  %p1573_p6 = scmp.lt.s32.totalorder %s1567_s8, %s1567_s8 }
 0x235   :  { %v654_v52 = vmax.f32 %v544_v39, 0.0  ;;  %v1255_v53 = vpop.f32.mrb[30].mxu1 }
 0x236   :  { %v559_v56 = vadd.f32 %v1255_v53, %v1785_v10  ;;  %v553_v46 = vpop.f32.mrb[31].mxu1  ;;  %p1574_p7 = por %p1573_p6, %p1572_p5 }
 0x237   :  { %v554_v57 = vadd.f32 %v1785_v10, %v553_v46  ;;  %1330 = vmatprep.mubr.f32.mxu0 %v654_v52 }
 0x238   :  { %1331 = vmatmul.mubr.f32.gmra.mrb[28].mxu0 %v655_v55  ;;  %v657_v54 = vmax.f32 %v559_v56, 0.0  ;;  %p1575_p8 = pnand %p1574_p7, %p1568_p4 }
 0x239   :  { %v656_v58 = vmax.f32 %v554_v57, 0.0  ;;  %v1258_v59 = vpop.f32.mrb[32].mxu1 }
 0x23a   :  { %v569_v60 = vadd.f32 %v1258_v59, %v1785_v10  ;;  %v563_v61 = vpop.f32.mrb[33].mxu1 }
 0x23b   :  { %v564_v63 = vadd.f32 %v1785_v10, %v563_v61  ;;  %1333 = vmatprep.mubr.f32.mxu0 %v656_v58 }
 0x23c   :  { %1334 = vmatmul.mubr.f32.gmra.mrb[30].mxu0 %v657_v54  ;;  %v659_v1 = vmax.f32 %v569_v60, 0.0 }
 0x23d   :  { %v658_v62 = vmax.f32 %v564_v63, 0.0  ;;  %v1261_v0 = vpop.f32.mrb[34].mxu1 }
 0x23e   :  { %v579_v2 = vadd.f32 %v1261_v0, %v1785_v10  ;;  %v573_v3 = vpop.f32.mrb[35].mxu1 }
 0x23f   :  { %v574_v4 = vadd.f32 %v1785_v10, %v573_v3  ;;  %1336 = vmatprep.mubr.f32.mxu0 %v658_v62 }
 0x240   :  { %1337 = vmatmul.mubr.f32.gmra.mrb[32].mxu0 %v659_v1  ;;  %v661_v7 = vmax.f32 %v579_v2, 0.0 }
 0x241   :  { %v660_v5 = vmax.f32 %v574_v4, 0.0  ;;  %v1264_v6 = vpop.f32.mrb[36].mxu1 }
 0x242   :  { %v589_v8 = vadd.f32 %v1264_v6, %v1785_v10  ;;  %v583_v9 = vpop.f32.mrb[37].mxu1 }
 0x243   :  { %v584_v11 = vadd.f32 %v1785_v10, %v583_v9  ;;  %1339 = vmatprep.mubr.f32.mxu0 %v660_v5 }
 0x244   :  { %1340 = vmatmul.mubr.f32.gmra.mrb[34].mxu0 %v661_v7  ;;  %v663_v37 = vmax.f32 %v589_v8, 0.0 }
 0x245   :  { %v662_v12 = vmax.f32 %v584_v11, 0.0  ;;  %v1267_v13 = vpop.f32.mrb[38].mxu1 }
 0x246   :  { %v599_v14 = vadd.f32 %v1267_v13, %v1785_v10  ;;  %v593_v15 = vpop.f32.mrb[39].mxu1 }
 0x247   :  { %v594_v16 = vadd.f32 %v1785_v10, %v593_v15  ;;  %1342 = vmatprep.mubr.f32.mxu0 %v662_v12 }
 0x248   :  { %1343 = vmatmul.mubr.f32.gmra.mrb[36].mxu0 %v663_v37  ;;  %v665_v19 = vmax.f32 %v599_v14, 0.0 }
 0x249   :  { %v664_v17 = vmax.f32 %v594_v16, 0.0  ;;  %v1270_v18 = vpop.f32.mrb[40].mxu1 }
 0x24a   :  { %v609_v20 = vadd.f32 %v1270_v18, %v1785_v10  ;;  %v603_v21 = vpop.f32.mrb[41].mxu1 }
 0x24b   :  { %v604_v22 = vadd.f32 %v1785_v10, %v603_v21  ;;  %1345 = vmatprep.mubr.f32.mxu0 %v664_v17 }
 0x24c   :  { %1346 = vmatmul.mubr.f32.gmra.mrb[38].mxu0 %v665_v19  ;;  %v667_v25 = vmax.f32 %v609_v20, 0.0 }
 0x24d   :  { %v666_v23 = vmax.f32 %v604_v22, 0.0  ;;  %v1273_v24 = vpop.f32.mrb[42].mxu1 }
 0x24e   :  { %v619_v26 = vadd.f32 %v1273_v24, %v1785_v10  ;;  %v613_v27 = vpop.f32.mrb[43].mxu1 }
 0x24f   :  { %v614_v28 = vadd.f32 %v1785_v10, %v613_v27  ;;  %1348 = vmatprep.mubr.f32.mxu0 %v666_v23 }
 0x250   :  { %1349 = vmatmul.mubr.f32.gmra.mrb[40].mxu0 %v667_v25  ;;  %v669_v31 = vmax.f32 %v619_v26, 0.0 }
 0x251   :  { %v668_v29 = vmax.f32 %v614_v28, 0.0  ;;  %v1276_v30 = vpop.f32.mrb[44].mxu1 }
 0x252   :  { %v629_v32 = vadd.f32 %v1276_v30, %v1785_v10  ;;  %v623_v33 = vpop.f32.mrb[45].mxu1 }
 0x253   :  { %v624_v34 = vadd.f32 %v1785_v10, %v623_v33  ;;  %1351 = vmatprep.mubr.f32.mxu0 %v668_v29 }
 0x254   :  { %1352 = vmatmul.mubr.f32.gmra.mrb[42].mxu0 %v669_v31  ;;  %v671_v38 = vmax.f32 %v629_v32, 0.0 }
 0x255   :  { %v670_v35 = vmax.f32 %v624_v34, 0.0  ;;  %v1279_v36 = vpop.f32.mrb[46].mxu1 }
 0x256   :  { %v639_v40 = vadd.f32 %v1279_v36, %v1785_v10  ;;  %v633_v41 = vpop.f32.mrb[47].mxu1 }
 0x257   :  { %v634_v43 = vadd.f32 %v1785_v10, %v633_v41  ;;  %1354 = vmatprep.mubr.f32.mxu0 %v670_v35 }
 0x258   :  { %1355 = vmatmul.mubr.f32.gmra.mrb[44].mxu0 %v671_v38  ;;  %v673_v42 = vmax.f32 %v639_v40, 0.0 }
 0x259   :  { %v672_v44 = vmax.f32 %v634_v43, 0.0 }
 0x25b   :  { %1357 = vmatprep.mubr.f32.mxu0 %v672_v44 }
 0x25c   :  { %1358 = vmatmul.mubr.f32.gmra.mrb[46].mxu0 %v673_v42 }
 0x2f3   :  { %v1314_v47 = vpop.f32.mrb[16].mxu0 }
 0x2f4   :  { %v769_v48 = vadd.f32 %v1314_v47, %v1822_v45  ;;  %v763_v49 = vpop.f32.mrb[17].mxu0 }
 0x2f5   :  { %v764_v50 = vadd.f32 %v1822_v45, %v763_v49 }
 0x2f6   :  { %923 = vst [vmem:[#allocation10 + $0x8] sm:$0xff] %v769_v48 }
 0x2f7   :  { %922 = vst [vmem:[#allocation10] sm:$0xff] %v764_v50  ;;  %v1317_v10 = vpop.f32.mrb[18].mxu0 }
 0x2f8   :  { %v779_v51 = vadd.f32 %v1317_v10, %v1822_v45  ;;  %v773_v39 = vpop.f32.mrb[19].mxu0 }
 0x2f9   :  { %v774_v52 = vadd.f32 %v1822_v45, %v773_v39 }
 0x2fa   :  { %925 = vst [vmem:[#allocation10 + $0x18] sm:$0xff] %v779_v51 }
 0x2fb   :  { %924 = vst [vmem:[#allocation10 + $0x10] sm:$0xff] %v774_v52  ;;  %v1320_v53 = vpop.f32.mrb[20].mxu0 }
 0x2fc   :  { %v789_v55 = vadd.f32 %v1320_v53, %v1822_v45  ;;  %v783_v56 = vpop.f32.mrb[21].mxu0 }
 0x2fd   :  { %v784_v46 = vadd.f32 %v1822_v45, %v783_v56 }
 0x2fe   :  { %927 = vst [vmem:[#allocation10 + $0x28] sm:$0xff] %v789_v55 }
 0x2ff   :  { %926 = vst [vmem:[#allocation10 + $0x20] sm:$0xff] %v784_v46  ;;  %v1323_v57 = vpop.f32.mrb[22].mxu0 }
 0x300   :  { %v799_v58 = vadd.f32 %v1323_v57, %v1822_v45  ;;  %v793_v59 = vpop.f32.mrb[23].mxu0 }
 0x301   :  { %v794_v54 = vadd.f32 %v1822_v45, %v793_v59 }
 0x302   :  { %929 = vst [vmem:[#allocation10 + $0x38] sm:$0xff] %v799_v58 }
 0x303   :  { %928 = vst [vmem:[#allocation10 + $0x30] sm:$0xff] %v794_v54  ;;  %v1326_v60 = vpop.f32.mrb[24].mxu0 }
 0x304   :  { %v809_v61 = vadd.f32 %v1326_v60, %v1822_v45  ;;  %v803_v63 = vpop.f32.mrb[25].mxu0 }
 0x305   :  { %v804_v62 = vadd.f32 %v1822_v45, %v803_v63 }
 0x306   :  { %931 = vst [vmem:[#allocation10 + $0x48] sm:$0xff] %v809_v61 }
 0x307   :  { %930 = vst [vmem:[#allocation10 + $0x40] sm:$0xff] %v804_v62  ;;  %v1329_v0 = vpop.f32.mrb[26].mxu0 }
 0x308   :  { %v819_v1 = vadd.f32 %v1329_v0, %v1822_v45  ;;  %v813_v2 = vpop.f32.mrb[27].mxu0 }
 0x309   :  { %v814_v3 = vadd.f32 %v1822_v45, %v813_v2 }
 0x30a   :  { %933 = vst [vmem:[#allocation10 + $0x58] sm:$0xff] %v819_v1 }
 0x30b   :  { %932 = vst [vmem:[#allocation10 + $0x50] sm:$0xff] %v814_v3  ;;  %v1332_v4 = vpop.f32.mrb[28].mxu0 }
 0x30c   :  { %v829_v5 = vadd.f32 %v1332_v4, %v1822_v45  ;;  %v823_v6 = vpop.f32.mrb[29].mxu0 }
 0x30d   :  { %v824_v7 = vadd.f32 %v1822_v45, %v823_v6 }
 0x30e   :  { %935 = vst [vmem:[#allocation10 + $0x68] sm:$0xff] %v829_v5 }
 0x30f   :  { %934 = vst [vmem:[#allocation10 + $0x60] sm:$0xff] %v824_v7  ;;  %v1335_v8 = vpop.f32.mrb[30].mxu0 }
 0x310   :  { %v839_v9 = vadd.f32 %v1335_v8, %v1822_v45  ;;  %v833_v11 = vpop.f32.mrb[31].mxu0 }
 0x311   :  { %v834_v12 = vadd.f32 %v1822_v45, %v833_v11 }
 0x312   :  { %937 = vst [vmem:[#allocation10 + $0x78] sm:$0xff] %v839_v9 }
 0x313   :  { %936 = vst [vmem:[#allocation10 + $0x70] sm:$0xff] %v834_v12  ;;  %v1338_v13 = vpop.f32.mrb[32].mxu0 }
 0x314   :  { %v849_v37 = vadd.f32 %v1338_v13, %v1822_v45  ;;  %v843_v14 = vpop.f32.mrb[33].mxu0 }
 0x315   :  { %v844_v15 = vadd.f32 %v1822_v45, %v843_v14 }
 0x316   :  { %939 = vst [vmem:[#allocation10 + $0x88] sm:$0xff] %v849_v37 }
 0x317   :  { %938 = vst [vmem:[#allocation10 + $0x80] sm:$0xff] %v844_v15  ;;  %v1341_v16 = vpop.f32.mrb[34].mxu0 }
 0x318   :  { %v859_v17 = vadd.f32 %v1341_v16, %v1822_v45  ;;  %v853_v18 = vpop.f32.mrb[35].mxu0 }
 0x319   :  { %v854_v19 = vadd.f32 %v1822_v45, %v853_v18 }
 0x31a   :  { %941 = vst [vmem:[#allocation10 + $0x98] sm:$0xff] %v859_v17 }
 0x31b   :  { %940 = vst [vmem:[#allocation10 + $0x90] sm:$0xff] %v854_v19  ;;  %v1344_v20 = vpop.f32.mrb[36].mxu0 }
 0x31c   :  { %v869_v21 = vadd.f32 %v1344_v20, %v1822_v45  ;;  %v863_v22 = vpop.f32.mrb[37].mxu0 }
 0x31d   :  { %v864_v23 = vadd.f32 %v1822_v45, %v863_v22 }
 0x31e   :  { %943 = vst [vmem:[#allocation10 + $0xa8] sm:$0xff] %v869_v21 }
 0x31f   :  { %942 = vst [vmem:[#allocation10 + $0xa0] sm:$0xff] %v864_v23  ;;  %v1347_v24 = vpop.f32.mrb[38].mxu0 }
 0x320   :  { %v879_v25 = vadd.f32 %v1347_v24, %v1822_v45  ;;  %v873_v26 = vpop.f32.mrb[39].mxu0 }
 0x321   :  { %v874_v27 = vadd.f32 %v1822_v45, %v873_v26 }
 0x322   :  { %945 = vst [vmem:[#allocation10 + $0xb8] sm:$0xff] %v879_v25 }
 0x323   :  { %944 = vst [vmem:[#allocation10 + $0xb0] sm:$0xff] %v874_v27  ;;  %v1350_v28 = vpop.f32.mrb[40].mxu0 }
 0x324   :  { %v889_v29 = vadd.f32 %v1350_v28, %v1822_v45  ;;  %v883_v30 = vpop.f32.mrb[41].mxu0 }
 0x325   :  { %v884_v31 = vadd.f32 %v1822_v45, %v883_v30 }
 0x326   :  { %947 = vst [vmem:[#allocation10 + $0xc8] sm:$0xff] %v889_v29 }
 0x327   :  { %946 = vst [vmem:[#allocation10 + $0xc0] sm:$0xff] %v884_v31  ;;  %v1353_v32 = vpop.f32.mrb[42].mxu0 }
 0x328   :  { %v899_v33 = vadd.f32 %v1353_v32, %v1822_v45  ;;  %v893_v34 = vpop.f32.mrb[43].mxu0 }
 0x329   :  { %v894_v35 = vadd.f32 %v1822_v45, %v893_v34 }
 0x32a   :  { %949 = vst [vmem:[#allocation10 + $0xd8] sm:$0xff] %v899_v33 }
 0x32b   :  { %948 = vst [vmem:[#allocation10 + $0xd0] sm:$0xff] %v894_v35  ;;  %v1356_v36 = vpop.f32.mrb[44].mxu0 }
 0x32c   :  { %v909_v38 = vadd.f32 %v1356_v36, %v1822_v45  ;;  %v903_v40 = vpop.f32.mrb[45].mxu0 }
 0x32d   :  { %v904_v41 = vadd.f32 %v1822_v45, %v903_v40 }
 0x32e   :  { %951 = vst [vmem:[#allocation10 + $0xe8] sm:$0xff] %v909_v38 }
 0x32f   :  { %950 = vst [vmem:[#allocation10 + $0xe0] sm:$0xff] %v904_v41  ;;  %v1359_v43 = vpop.f32.mrb[46].mxu0 }
 0x330   :  { %v919_v44 = vadd.f32 %v1359_v43, %v1822_v45  ;;  %v913_v42 = vpop.f32.mrb[47].mxu0 }
 0x331   :  { %v914_v47 = vadd.f32 %v1822_v45, %v913_v42 }
 0x332   :  { %953 = vst [vmem:[#allocation10 + $0xf8] sm:$0xff] %v919_v44 }
 0x333   :  { %952 = vst [vmem:[#allocation10 + $0xf0] sm:$0xff] %v914_v47 }
 0x334   :  { %1578 = shalt.err (!%p1575_p8)
}
 0x335   :  { %s1579_s11 = scalar_lea.hbm %s1878_s7, 4096 }
 0x336   :  { %p1580_p9 = scmp.ne.s32.totalorder %s1878_s7, %s1579_s11  ;;  %p1583_p10 = scmp.lt.u32.totalorder %s1579_s11, %s1878_s7 }
 0x338   :  { %p1585_p11 = pnand %p1583_p10, %p1580_p9 }
 0x33a   :  { %1588 = shalt.err (!%p1585_p11)
}
 0x33b   :  { %965 = dma.vmem_to_hbm [thread:$0]  %s960_s30, 4096, %s1878_s7, [#allocation4], %s1599_s13, %s1599_s13, %s1600_s14  }
 0x33c   :  { %1595 = dma.done.wait [#allocation4], 4096  }
 0x33d   :  { %1596 = vsyncadd [#allocation4], 4294963200 }
 0x33e   :  { %969 = vsyncpa [#allocation3], 1 }
 0x33f   :  { %970 = vsyncpa [#allocation6], 1 }
 0x340   :  { %971 = vsyncpa [#allocation9], 1 }
 0x341   :  { %972 = vsyncpa [#allocation4], 1 }

</bundles_post_ra>
